<compile_context>
chip_gen: v5e
topology: v5e:2x2
jax: 0.10.0
libtpu: 0.0.40
codegen_flags: <defaults>
</compile_context>

<pallas_src>
import math
import jax
import jax.numpy as jnp
import numpy as np
from jax.experimental import pallas as pl
from jax.experimental.pallas import tpu as pltpu

# ---------------- config (small, consistent with GemmaConfig) ----------------
B, S = 2, 8                 # batch, seq_len
HIDDEN = 32                 # hidden_size
NUM_HEADS = 4               # num_attention_heads
NUM_KV_HEADS = 1            # num_key_value_heads (GQA)
HEAD_DIM = 16               # head_dim
INTER = 64                  # intermediate_size
EPS = 1e-6                  # rms_norm_eps
ROPE_THETA = 10000.0        # rope_theta
NEG_INF = -1e9              # additive mask value for disallowed positions

# bf16 at the MXU (f32 accumulate), f32 everywhere element-wise.
MXU_DTYPE = jnp.bfloat16

# TODO(synk): general GQA (NUM_KV_HEADS > 1) needs head-batched k/v projections
# and a per-query-group repeat along the leading axis.
assert NUM_KV_HEADS == 1


# ---------------------------- in-kernel helpers -------------------------------
def _gelu_tanh(x):
    # F.gelu(x, approximate='tanh')
    c = math.sqrt(2.0 / math.pi)
    return 0.5 * x * (1.0 + jnp.tanh(c * (x + 0.044715 * x * x * x)))


# --------------------------------- kernel -------------------------------------
def decoder_layer_kernel(x_ref, cs_ref, ln_ref, wq_ref, wkv_ref, wo_ref,
                         wgu_ref, wd_ref, out_ref):
    # One grid step == one batch element.  x / cos|sin are per-batch BlockSpec
    # slices; weights are whole (block index constant across the grid, so they
    # are DMA'd effectively once).
    x = x_ref[...]                                              # (S, H) f32

    lnw = ln_ref[...]                                           # (2, H): 1 + weight
    ln1p = lnw[0:1, :]
    ln2p = lnw[1:2, :]

    # ---- input RMSNorm (f32) ----
    ms = jnp.mean(x * x, axis=-1, keepdims=True)
    xn = x * jax.lax.rsqrt(ms + EPS) * ln1p                     # (S, H)
    xn_mx = xn.astype(MXU_DTYPE)

    # ---- Q projection, head-batched: (NH, S, H) x (NH, H, HD) -> (NH, S, HD).
    #      Heads live on the leading (tile) axis, never on the lane axis, so no
    #      lane<->sublane relayout is ever needed downstream.
    xn_b = jnp.broadcast_to(xn_mx[None], (NUM_HEADS, S, HIDDEN))
    q = jnp.einsum('nsh,nhd->nsd', xn_b, wq_ref[...],
                   preferred_element_type=jnp.float32)          # (NH, S, HD)

    # ---- K / V projections (single KV head); k|v stacked on the leading axis.
    k = jnp.dot(xn_mx, wkv_ref[0], preferred_element_type=jnp.float32)  # (S, HD)
    v = jnp.dot(xn_mx, wkv_ref[1], preferred_element_type=jnp.float32)  # (S, HD)

    # ---- RoPE: rotate_half(x) == roll(x, HD/2, lane) * sign  (XLU roll; no
    #      lane concatenate, no duplicated weight columns).
    half = HEAD_DIM // 2
    cos = cs_ref[0]                                             # (S, HD)
    sin = cs_ref[1]                                             # (S, HD)
    lane = jax.lax.broadcasted_iota(jnp.int32, (S, HEAD_DIM), 1)
    sign_sin = jnp.where(lane < half, -sin, sin)                # (S, HD)
    q2 = q.reshape(NUM_HEADS * S, HEAD_DIM)                     # free: leading-dim merge
    qrot = pltpu.roll(q2, half, axis=1).reshape(NUM_HEADS, S, HEAD_DIM)
    q = q * cos[None] + qrot * sign_sin[None]
    k = k * cos + pltpu.roll(k, half, axis=1) * sign_sin

    # ---- attention: all heads in one batched matmul; the shared KV head is
    #      broadcast along the leading axis (repeat_kv with no lane movement).
    k_b = jnp.broadcast_to(k.astype(MXU_DTYPE)[None], (NUM_HEADS, S, HEAD_DIM))
    v_b = jnp.broadcast_to(v.astype(MXU_DTYPE)[None], (NUM_HEADS, S, HEAD_DIM))
    scores = jnp.einsum('nsd,ntd->nst', q.astype(MXU_DTYPE), k_b,
                        preferred_element_type=jnp.float32)     # (NH, S, S)
    scores = scores * (1.0 / math.sqrt(HEAD_DIM))

    # causal mask generated in-kernel (cheap VPU iota/compare; no mask DMA).
    # TODO(synk): an arbitrary externally-supplied additive mask would instead be
    # passed as a per-batch (None, S, S) BlockSpec operand.
    row = jax.lax.broadcasted_iota(jnp.int32, (S, S), 0)
    col = jax.lax.broadcasted_iota(jnp.int32, (S, S), 1)
    mask = jnp.where(col <= row, 0.0, NEG_INF)                  # (S, S) f32
    scores = scores + mask[None]

    # ---- f32 softmax; normalization on the EUP reciprocal slot ----
    m = jnp.max(scores, axis=-1, keepdims=True)
    p = jnp.exp(scores - m)
    denom = jnp.sum(p, axis=-1, keepdims=True)
    p = p * pl.reciprocal(denom, approx=True)

    attn = jnp.einsum('nst,ntd->nsd', p.astype(MXU_DTYPE), v_b,
                      preferred_element_type=jnp.float32)       # (NH, S, HD)

    # ---- o-proj: head-batched matmul then reduce over heads (no relayout) ----
    o = jnp.einsum('nsd,ndh->nsh', attn.astype(MXU_DTYPE), wo_ref[...],
                   preferred_element_type=jnp.float32)          # (NH, S, H)
    attn_out = jnp.sum(o, axis=0)                               # (S, H)

    h1 = x + attn_out                                           # residual 1

    # ---- post-attention RMSNorm + gated GELU MLP (gate|up on the leading axis) ----
    ms2 = jnp.mean(h1 * h1, axis=-1, keepdims=True)
    hn = (h1 * jax.lax.rsqrt(ms2 + EPS) * ln2p).astype(MXU_DTYPE)
    g = jnp.dot(hn, wgu_ref[0], preferred_element_type=jnp.float32)   # (S, I)
    u = jnp.dot(hn, wgu_ref[1], preferred_element_type=jnp.float32)   # (S, I)
    z = (_gelu_tanh(g) * u).astype(MXU_DTYPE)
    d = jnp.dot(z, wd_ref[...], preferred_element_type=jnp.float32)   # (S, H)

    out_ref[...] = (h1 + d).astype(out_ref.dtype)
    # TODO(synk): production Gemma shapes (hidden 3072, inter 24576) need the MLP
    # and o-proj weights tiled over the intermediate dim with an extra "arbitrary"
    # grid axis + VMEM accumulator, >=256-wide K/N tiles to fill the MXU, and
    # vmem_limit_bytes set explicitly (v7x: ~half the v6e tile, 64 MiB VMEM).


# --------------------------------- wrapper ------------------------------------
def gemma_decoder_layer(x, cos, sin, params):
    ln1, ln2, wq, wk, wv, wo, wg, wu, wd = params

    # wrapper-side (plain XLA) prep, done once
    ln_pack = jnp.concatenate([1.0 + ln1, 1.0 + ln2], axis=0)            # (2, H)
    wq3 = jnp.transpose(wq.reshape(HIDDEN, NUM_HEADS, HEAD_DIM),
                        (1, 0, 2)).astype(MXU_DTYPE)                     # (NH, H, HD)
    wkv = jnp.stack([wk, wv], axis=0).astype(MXU_DTYPE)                  # (2, H, HD)
    wo3 = wo.reshape(NUM_HEADS, HEAD_DIM, HIDDEN).astype(MXU_DTYPE)      # (NH, HD, H)
    wgu = jnp.stack([wg, wu], axis=0).astype(MXU_DTYPE)                  # (2, H, I)
    wdc = wd.astype(MXU_DTYPE)                                           # (I, H)
    cos_sin = jnp.stack([cos, sin], axis=1)                              # (B, 2, S, HD)

    def whole(shape):
        return pl.BlockSpec(shape, lambda b: (0,) * len(shape))

    out = pl.pallas_call(
        decoder_layer_kernel,
        out_shape=jax.ShapeDtypeStruct((B, S, HIDDEN), x.dtype),
        grid=(B,),
        in_specs=[
            pl.BlockSpec((None, S, HIDDEN), lambda b: (b, 0, 0)),          # x (per batch)
            pl.BlockSpec((None, 2, S, HEAD_DIM), lambda b: (b, 0, 0, 0)),  # cos|sin (per batch)
            whole((2, HIDDEN)),                      # 1+ln1 | 1+ln2
            whole((NUM_HEADS, HIDDEN, HEAD_DIM)),    # wq, head-major
            whole((2, HIDDEN, HEAD_DIM)),            # wk | wv
            whole((NUM_HEADS, HEAD_DIM, HIDDEN)),    # wo, head-major
            whole((2, HIDDEN, INTER)),               # wg | wu
            whole((INTER, HIDDEN)),                  # wd
        ],
        out_specs=pl.BlockSpec((None, S, HIDDEN), lambda b: (b, 0, 0)),
        compiler_params=pltpu.CompilerParams(
            dimension_semantics=("parallel",)),      # batch axis -> both v7x TensorCores
    )(x, cos_sin, ln_pack, wq3, wkv, wo3, wgu, wdc)
    return out


# ---------------------------- pure-JAX reference -------------------------------
def reference(x, mask, cos, sin, params):
    ln1, ln2, wq, wk, wv, wo, wg, wu, wd = params

    def rms(x, w):
        xf = x.astype(jnp.float32)
        ms = jnp.mean(xf * xf, axis=-1, keepdims=True)
        return xf * jax.lax.rsqrt(ms + EPS) * (1.0 + w.astype(jnp.float32))

    def rot_half(t):
        d = t.shape[-1]
        return jnp.concatenate([-t[..., d // 2:], t[..., :d // 2]], axis=-1)

    xn = rms(x, ln1)
    q = (xn @ wq).reshape(B, S, NUM_HEADS, HEAD_DIM).transpose(0, 2, 1, 3)
    k = (xn @ wk).reshape(B, S, NUM_KV_HEADS, HEAD_DIM).transpose(0, 2, 1, 3)
    v = (xn @ wv).reshape(B, S, NUM_KV_HEADS, HEAD_DIM).transpose(0, 2, 1, 3)
    c, s = cos[:, None], sin[:, None]
    q = q * c + rot_half(q) * s
    k = k * c + rot_half(k) * s
    rep = NUM_HEADS // NUM_KV_HEADS
    k = jnp.repeat(k, rep, axis=1)
    v = jnp.repeat(v, rep, axis=1)
    scores = jnp.einsum("bhqd,bhkd->bhqk", q, k) / math.sqrt(HEAD_DIM)
    scores = scores + mask[:, None]
    p = jax.nn.softmax(scores, axis=-1)
    attn = jnp.einsum("bhqk,bhkd->bhqd", p, v)
    attn = attn.transpose(0, 2, 1, 3).reshape(B, S, NUM_HEADS * HEAD_DIM) @ wo
    h1 = x + attn
    hn = rms(h1, ln2)
    c2 = math.sqrt(2.0 / math.pi)
    g = hn @ wg
    g = 0.5 * g * (1.0 + jnp.tanh(c2 * (g + 0.044715 * g ** 3)))
    z = g * (hn @ wu)
    return h1 + z @ wd


# ----------------------------------- main --------------------------------------
if __name__ == "__main__":
    key = jax.random.PRNGKey(0)
    ks = jax.random.split(key, 12)

    x = jax.random.normal(ks[0], (B, S, HIDDEN), jnp.float32)

    # deterministic "parameters" (linear weights pre-transposed to (in, out))
    sc = 0.05
    ln1 = jax.random.normal(ks[1], (1, HIDDEN), jnp.float32) * sc
    ln2 = jax.random.normal(ks[2], (1, HIDDEN), jnp.float32) * sc
    wq = jax.random.normal(ks[3], (HIDDEN, NUM_HEADS * HEAD_DIM), jnp.float32) * sc
    wk = jax.random.normal(ks[4], (HIDDEN, NUM_KV_HEADS * HEAD_DIM), jnp.float32) * sc
    wv = jax.random.normal(ks[5], (HIDDEN, NUM_KV_HEADS * HEAD_DIM), jnp.float32) * sc
    wo = jax.random.normal(ks[6], (NUM_HEADS * HEAD_DIM, HIDDEN), jnp.float32) * sc
    wg = jax.random.normal(ks[7], (HIDDEN, INTER), jnp.float32) * sc
    wu = jax.random.normal(ks[8], (HIDDEN, INTER), jnp.float32) * sc
    wd = jax.random.normal(ks[9], (INTER, HIDDEN), jnp.float32) * sc
    params = (ln1, ln2, wq, wk, wv, wo, wg, wu, wd)

    # RoPE tables (GemmaRotaryEmbedding, position_ids = arange(S) per batch)
    theta = 1.0 / (ROPE_THETA ** (jnp.arange(0, HEAD_DIM, 2, dtype=jnp.float32) / HEAD_DIM))
    pos = jnp.broadcast_to(jnp.arange(S, dtype=jnp.float32)[None, :], (B, S))
    freqs = pos[:, :, None] * theta[None, None, :]          # (B, S, HD/2)
    emb = jnp.concatenate([freqs, freqs], axis=-1)          # (B, S, HD)
    cos, sin = jnp.cos(emb), jnp.sin(emb)

    # causal additive attention mask (B, S, S) — used by the reference; the
    # Pallas kernel regenerates the same causal mask in-kernel.
    i = jnp.arange(S)[:, None]
    j = jnp.arange(S)[None, :]
    causal = jnp.where(j <= i, 0.0, NEG_INF).astype(jnp.float32)
    mask = jnp.broadcast_to(causal[None], (B, S, S))

    out = gemma_decoder_layer(x, cos, sin, params)
    out = jax.block_until_ready(out)

    ref = jax.block_until_ready(reference(x, mask, cos, sin, params))
    # bf16-fed MXU + approx reciprocal vs. an exact f32 reference; set
    # MXU_DTYPE = jnp.float32 and approx=False to recover <= 2e-5 parity.
    np.testing.assert_allclose(np.asarray(out), np.asarray(ref), rtol=2e-2, atol=2e-2)

    print("KERNEL_OK")
</pallas_src>

<mosaic_0001>
module attributes {stable_mosaic.version = 11 : i64} {
  func.func @decoder_layer_kernel(%arg0: i32, %arg1: memref<1x8x32xf32, #tpu.memory_space<vmem>>, %arg2: memref<1x2x8x16xf32, #tpu.memory_space<vmem>>, %arg3: memref<2x32xf32, #tpu.memory_space<vmem>>, %arg4: memref<4x32x16xbf16, #tpu.memory_space<vmem>>, %arg5: memref<2x32x16xbf16, #tpu.memory_space<vmem>>, %arg6: memref<4x16x32xbf16, #tpu.memory_space<vmem>>, %arg7: memref<2x32x64xbf16, #tpu.memory_space<vmem>>, %arg8: memref<64x32xbf16, #tpu.memory_space<vmem>>, %arg9: memref<1x8x32xf32, #tpu.memory_space<vmem>>) attributes {dimension_semantics = [#tpu.dimension_semantics<parallel>], iteration_bounds = array<i64: 2>, scalar_prefetch = 0 : i64, scratch_operands = 0 : i64, tpu.core_type = #tpu.core_type<tc>, window_params = [{transform_indices = @transform_0, window_bounds = array<i64: 1, 8, 32>}, {transform_indices = @transform_1, window_bounds = array<i64: 1, 2, 8, 16>}, {pipeline_mode = #tpu.pipeline_mode<synchronous>, transform_indices = @transform_2, window_bounds = array<i64: 2, 32>}, {pipeline_mode = #tpu.pipeline_mode<synchronous>, transform_indices = @transform_3, window_bounds = array<i64: 4, 32, 16>}, {pipeline_mode = #tpu.pipeline_mode<synchronous>, transform_indices = @transform_4, window_bounds = array<i64: 2, 32, 16>}, {pipeline_mode = #tpu.pipeline_mode<synchronous>, transform_indices = @transform_5, window_bounds = array<i64: 4, 16, 32>}, {pipeline_mode = #tpu.pipeline_mode<synchronous>, transform_indices = @transform_6, window_bounds = array<i64: 2, 32, 64>}, {pipeline_mode = #tpu.pipeline_mode<synchronous>, transform_indices = @transform_7, window_bounds = array<i64: 64, 32>}, {transform_indices = @transform_8, window_bounds = array<i64: 1, 8, 32>}]} {
    %c0 = arith.constant 0 : index
    %c0_0 = arith.constant 0 : index
    %c0_1 = arith.constant 0 : index
    %0 = vector.load %arg1[%c0, %c0_0, %c0_1] : memref<1x8x32xf32, #tpu.memory_space<vmem>>, vector<1x8x32xf32>
    %1 = vector.shape_cast %0 : vector<1x8x32xf32> to vector<8x32xf32>
    %c0_2 = arith.constant 0 : index
    %c0_3 = arith.constant 0 : index
    %2 = vector.load %arg3[%c0_2, %c0_3] : memref<2x32xf32, #tpu.memory_space<vmem>>, vector<2x32xf32>
    %3 = vector.extract_strided_slice %2 {offsets = [0, 0], sizes = [1, 32], strides = [1, 1]} : vector<2x32xf32> to vector<1x32xf32>
    %4 = vector.extract_strided_slice %2 {offsets = [1, 0], sizes = [1, 32], strides = [1, 1]} : vector<2x32xf32> to vector<1x32xf32>
    %5 = arith.mulf %1, %1 : vector<8x32xf32>
    %cst = arith.constant dense<0.000000e+00> : vector<8xf32>
    %6 = vector.multi_reduction <add>, %5, %cst [1] : vector<8x32xf32> to vector<8xf32>
    %7 = vector.shape_cast %6 : vector<8xf32> to vector<8x1xf32>
    %cst_4 = arith.constant 3.200000e+01 : f32
    %8 = vector.broadcast %cst_4 : f32 to vector<8x1xf32>
    %9 = arith.divf %7, %8 : vector<8x1xf32>
    %cst_5 = arith.constant 9.99999997E-7 : f32
    %10 = vector.broadcast %cst_5 : f32 to vector<8x1xf32>
    %11 = arith.addf %9, %10 : vector<8x1xf32>
    %12 = math.rsqrt %11 : vector<8x1xf32>
    %13 = vector.broadcast %12 : vector<8x1xf32> to vector<8x32xf32>
    %14 = arith.mulf %1, %13 : vector<8x32xf32>
    %15 = vector.broadcast %3 : vector<1x32xf32> to vector<8x32xf32>
    %16 = arith.mulf %14, %15 : vector<8x32xf32>
    %17 = arith.truncf %16 : vector<8x32xf32> to vector<8x32xbf16>
    %18 = vector.shape_cast %17 : vector<8x32xbf16> to vector<1x8x32xbf16>
    %19 = vector.shape_cast %18 : vector<1x8x32xbf16> to vector<1x8x32xbf16>
    %20 = vector.broadcast %19 : vector<1x8x32xbf16> to vector<4x8x32xbf16>
    %c0_6 = arith.constant 0 : index
    %c0_7 = arith.constant 0 : index
    %c0_8 = arith.constant 0 : index
    %21 = vector.load %arg4[%c0_6, %c0_7, %c0_8] : memref<4x32x16xbf16, #tpu.memory_space<vmem>>, vector<4x32x16xbf16>
    "tpu.trace_start"() <{level = 10 : i32, message = "nsh,nhd->nsd"}> : () -> ()
    %cst_9 = arith.constant dense<0.000000e+00> : vector<4x8x16xf32>
    %22 = tpu.matmul %20, %21, %cst_9 {dimension_numbers = #tpu.dot_dimension_numbers<[2], [1], [1], [2], [0, 0, 0, 1, 1, 2], [0], [0]>} : vector<4x8x32xbf16>, vector<4x32x16xbf16>, vector<4x8x16xf32> -> vector<4x8x16xf32>
    "tpu.trace_stop"() : () -> ()
    %c0_10 = arith.constant 0 : index
    %c0_11 = arith.constant 0 : index
    %c0_12 = arith.constant 0 : index
    %23 = vector.load %arg5[%c0_10, %c0_11, %c0_12] : memref<2x32x16xbf16, #tpu.memory_space<vmem>>, vector<1x32x16xbf16>
    %24 = vector.shape_cast %23 : vector<1x32x16xbf16> to vector<32x16xbf16>
    %cst_13 = arith.constant dense<0.000000e+00> : vector<8x16xf32>
    %25 = tpu.matmul %17, %24, %cst_13 {dimension_numbers = #tpu.dot_dimension_numbers<[1], [0], [0], [1], [0, 0, 1, 1], [], []>} : vector<8x32xbf16>, vector<32x16xbf16>, vector<8x16xf32> -> vector<8x16xf32>
    %c1 = arith.constant 1 : index
    %c0_14 = arith.constant 0 : index
    %c0_15 = arith.constant 0 : index
    %26 = vector.load %arg5[%c1, %c0_14, %c0_15] : memref<2x32x16xbf16, #tpu.memory_space<vmem>>, vector<1x32x16xbf16>
    %27 = vector.shape_cast %26 : vector<1x32x16xbf16> to vector<32x16xbf16>
    %cst_16 = arith.constant dense<0.000000e+00> : vector<8x16xf32>
    %28 = tpu.matmul %17, %27, %cst_16 {dimension_numbers = #tpu.dot_dimension_numbers<[1], [0], [0], [1], [0, 0, 1, 1], [], []>} : vector<8x32xbf16>, vector<32x16xbf16>, vector<8x16xf32> -> vector<8x16xf32>
    %c0_17 = arith.constant 0 : index
    %c0_18 = arith.constant 0 : index
    %c0_19 = arith.constant 0 : index
    %c0_20 = arith.constant 0 : index
    %29 = vector.load %arg2[%c0_17, %c0_18, %c0_19, %c0_20] : memref<1x2x8x16xf32, #tpu.memory_space<vmem>>, vector<1x1x8x16xf32>
    %30 = vector.shape_cast %29 : vector<1x1x8x16xf32> to vector<8x16xf32>
    %c0_21 = arith.constant 0 : index
    %c1_22 = arith.constant 1 : index
    %c0_23 = arith.constant 0 : index
    %c0_24 = arith.constant 0 : index
    %31 = vector.load %arg2[%c0_21, %c1_22, %c0_23, %c0_24] : memref<1x2x8x16xf32, #tpu.memory_space<vmem>>, vector<1x1x8x16xf32>
    %32 = vector.shape_cast %31 : vector<1x1x8x16xf32> to vector<8x16xf32>
    %33 = tpu.iota {dimensions = array<i32: 1>} : vector<8x16xi32>
    %c8_i32 = arith.constant 8 : i32
    %34 = vector.broadcast %c8_i32 : i32 to vector<8x16xi32>
    %35 = arith.cmpi slt, %33, %34 : vector<8x16xi32>
    %cst_25 = arith.constant 0.000000e+00 : f32
    %36 = vector.broadcast %cst_25 : f32 to vector<8x16xf32>
    %37 = arith.subf %36, %32 : vector<8x16xf32>
    %38 = arith.select %35, %37, %32 : vector<8x16xi1>, vector<8x16xf32>
    %39 = vector.shape_cast %22 : vector<4x8x16xf32> to vector<32x16xf32>
    %c8_i32_26 = arith.constant 8 : i32
    %40 = tpu.dynamic_rotate %39 by %c8_i32_26 dim 1 : vector<32x16xf32>, i32 -> vector<32x16xf32>
    %41 = vector.shape_cast %40 : vector<32x16xf32> to vector<4x8x16xf32>
    %42 = vector.shape_cast %30 : vector<8x16xf32> to vector<1x8x16xf32>
    %43 = vector.broadcast %42 : vector<1x8x16xf32> to vector<4x8x16xf32>
    %44 = arith.mulf %22, %43 : vector<4x8x16xf32>
    %45 = vector.shape_cast %38 : vector<8x16xf32> to vector<1x8x16xf32>
    %46 = vector.broadcast %45 : vector<1x8x16xf32> to vector<4x8x16xf32>
    %47 = arith.mulf %41, %46 : vector<4x8x16xf32>
    %48 = arith.addf %44, %47 : vector<4x8x16xf32>
    %49 = arith.mulf %25, %30 : vector<8x16xf32>
    %c8_i32_27 = arith.constant 8 : i32
    %50 = tpu.dynamic_rotate %25 by %c8_i32_27 dim 1 : vector<8x16xf32>, i32 -> vector<8x16xf32>
    %51 = arith.mulf %50, %38 : vector<8x16xf32>
    %52 = arith.addf %49, %51 : vector<8x16xf32>
    %53 = arith.truncf %52 : vector<8x16xf32> to vector<8x16xbf16>
    %54 = vector.shape_cast %53 : vector<8x16xbf16> to vector<1x8x16xbf16>
    %55 = vector.shape_cast %54 : vector<1x8x16xbf16> to vector<1x8x16xbf16>
    %56 = vector.broadcast %55 : vector<1x8x16xbf16> to vector<4x8x16xbf16>
    %57 = arith.truncf %28 : vector<8x16xf32> to vector<8x16xbf16>
    %58 = vector.shape_cast %57 : vector<8x16xbf16> to vector<1x8x16xbf16>
    %59 = vector.shape_cast %58 : vector<1x8x16xbf16> to vector<1x8x16xbf16>
    %60 = vector.broadcast %59 : vector<1x8x16xbf16> to vector<4x8x16xbf16>
    %61 = arith.truncf %48 : vector<4x8x16xf32> to vector<4x8x16xbf16>
    "tpu.trace_start"() <{level = 10 : i32, message = "nsd,ntd->nst"}> : () -> ()
    %cst_28 = arith.constant dense<0.000000e+00> : vector<4x8x8xf32>
    %62 = tpu.matmul %61, %56, %cst_28 {dimension_numbers = #tpu.dot_dimension_numbers<[2], [2], [1], [1], [0, 0, 0, 1, 1, 1], [0], [0]>} : vector<4x8x16xbf16>, vector<4x8x16xbf16>, vector<4x8x8xf32> -> vector<4x8x8xf32>
    "tpu.trace_stop"() : () -> ()
    %cst_29 = arith.constant 2.500000e-01 : f32
    %63 = vector.broadcast %cst_29 : f32 to vector<4x8x8xf32>
    %64 = arith.mulf %62, %63 : vector<4x8x8xf32>
    %65 = tpu.iota {dimensions = array<i32: 0>} : vector<8x8xi32>
    %66 = tpu.iota {dimensions = array<i32: 1>} : vector<8x8xi32>
    %67 = arith.cmpi sle, %66, %65 : vector<8x8xi32>
    %cst_30 = arith.constant 0.000000e+00 : f32
    %cst_31 = arith.constant -1.000000e+09 : f32
    %68 = vector.broadcast %cst_30 : f32 to vector<8x8xf32>
    %69 = vector.broadcast %cst_31 : f32 to vector<8x8xf32>
    %70 = arith.select %67, %68, %69 : vector<8x8xi1>, vector<8x8xf32>
    %71 = vector.shape_cast %70 : vector<8x8xf32> to vector<1x8x8xf32>
    %72 = vector.broadcast %71 : vector<1x8x8xf32> to vector<4x8x8xf32>
    %73 = arith.addf %64, %72 : vector<4x8x8xf32>
    %cst_32 = arith.constant dense<0xFF800000> : vector<4x8xf32>
    %74 = vector.multi_reduction <maximumf>, %73, %cst_32 [2] : vector<4x8x8xf32> to vector<4x8xf32>
    %75 = vector.shape_cast %74 : vector<4x8xf32> to vector<4x8x1xf32>
    %76 = vector.broadcast %75 : vector<4x8x1xf32> to vector<4x8x8xf32>
    %77 = arith.subf %73, %76 : vector<4x8x8xf32>
    %78 = math.exp %77 : vector<4x8x8xf32>
    %cst_33 = arith.constant dense<0.000000e+00> : vector<4x8xf32>
    %79 = vector.multi_reduction <add>, %78, %cst_33 [2] : vector<4x8x8xf32> to vector<4x8xf32>
    %80 = vector.shape_cast %79 : vector<4x8xf32> to vector<4x8x1xf32>
    %81 = tpu.reciprocal %80 {approx = true} : vector<4x8x1xf32> -> vector<4x8x1xf32>
    %82 = vector.broadcast %81 : vector<4x8x1xf32> to vector<4x8x8xf32>
    %83 = arith.mulf %78, %82 : vector<4x8x8xf32>
    %84 = arith.truncf %83 : vector<4x8x8xf32> to vector<4x8x8xbf16>
    "tpu.trace_start"() <{level = 10 : i32, message = "nst,ntd->nsd"}> : () -> ()
    %cst_34 = arith.constant dense<0.000000e+00> : vector<4x8x16xf32>
    %85 = tpu.matmul %84, %60, %cst_34 {dimension_numbers = #tpu.dot_dimension_numbers<[2], [1], [1], [2], [0, 0, 0, 1, 1, 2], [0], [0]>} : vector<4x8x8xbf16>, vector<4x8x16xbf16>, vector<4x8x16xf32> -> vector<4x8x16xf32>
    "tpu.trace_stop"() : () -> ()
    %86 = arith.truncf %85 : vector<4x8x16xf32> to vector<4x8x16xbf16>
    %c0_35 = arith.constant 0 : index
    %c0_36 = arith.constant 0 : index
    %c0_37 = arith.constant 0 : index
    %87 = vector.load %arg6[%c0_35, %c0_36, %c0_37] : memref<4x16x32xbf16, #tpu.memory_space<vmem>>, vector<4x16x32xbf16>
    "tpu.trace_start"() <{level = 10 : i32, message = "nsd,ndh->nsh"}> : () -> ()
    %cst_38 = arith.constant dense<0.000000e+00> : vector<4x8x32xf32>
    %88 = tpu.matmul %86, %87, %cst_38 {dimension_numbers = #tpu.dot_dimension_numbers<[2], [1], [1], [2], [0, 0, 0, 1, 1, 2], [0], [0]>} : vector<4x8x16xbf16>, vector<4x16x32xbf16>, vector<4x8x32xf32> -> vector<4x8x32xf32>
    "tpu.trace_stop"() : () -> ()
    %cst_39 = arith.constant dense<0.000000e+00> : vector<8x32xf32>
    %89 = vector.multi_reduction <add>, %88, %cst_39 [0] : vector<4x8x32xf32> to vector<8x32xf32>
    %90 = arith.addf %1, %89 : vector<8x32xf32>
    %91 = arith.mulf %90, %90 : vector<8x32xf32>
    %cst_40 = arith.constant dense<0.000000e+00> : vector<8xf32>
    %92 = vector.multi_reduction <add>, %91, %cst_40 [1] : vector<8x32xf32> to vector<8xf32>
    %93 = vector.shape_cast %92 : vector<8xf32> to vector<8x1xf32>
    %cst_41 = arith.constant 3.200000e+01 : f32
    %94 = vector.broadcast %cst_41 : f32 to vector<8x1xf32>
    %95 = arith.divf %93, %94 : vector<8x1xf32>
    %cst_42 = arith.constant 9.99999997E-7 : f32
    %96 = vector.broadcast %cst_42 : f32 to vector<8x1xf32>
    %97 = arith.addf %95, %96 : vector<8x1xf32>
    %98 = math.rsqrt %97 : vector<8x1xf32>
    %99 = vector.broadcast %98 : vector<8x1xf32> to vector<8x32xf32>
    %100 = arith.mulf %90, %99 : vector<8x32xf32>
    %101 = vector.broadcast %4 : vector<1x32xf32> to vector<8x32xf32>
    %102 = arith.mulf %100, %101 : vector<8x32xf32>
    %103 = arith.truncf %102 : vector<8x32xf32> to vector<8x32xbf16>
    %c0_43 = arith.constant 0 : index
    %c0_44 = arith.constant 0 : index
    %c0_45 = arith.constant 0 : index
    %104 = vector.load %arg7[%c0_43, %c0_44, %c0_45] : memref<2x32x64xbf16, #tpu.memory_space<vmem>>, vector<1x32x64xbf16>
    %105 = vector.shape_cast %104 : vector<1x32x64xbf16> to vector<32x64xbf16>
    %cst_46 = arith.constant dense<0.000000e+00> : vector<8x64xf32>
    %106 = tpu.matmul %103, %105, %cst_46 {dimension_numbers = #tpu.dot_dimension_numbers<[1], [0], [0], [1], [0, 0, 1, 1], [], []>} : vector<8x32xbf16>, vector<32x64xbf16>, vector<8x64xf32> -> vector<8x64xf32>
    %c1_47 = arith.constant 1 : index
    %c0_48 = arith.constant 0 : index
    %c0_49 = arith.constant 0 : index
    %107 = vector.load %arg7[%c1_47, %c0_48, %c0_49] : memref<2x32x64xbf16, #tpu.memory_space<vmem>>, vector<1x32x64xbf16>
    %108 = vector.shape_cast %107 : vector<1x32x64xbf16> to vector<32x64xbf16>
    %cst_50 = arith.constant dense<0.000000e+00> : vector<8x64xf32>
    %109 = tpu.matmul %103, %108, %cst_50 {dimension_numbers = #tpu.dot_dimension_numbers<[1], [0], [0], [1], [0, 0, 1, 1], [], []>} : vector<8x32xbf16>, vector<32x64xbf16>, vector<8x64xf32> -> vector<8x64xf32>
    %cst_51 = arith.constant 5.000000e-01 : f32
    %110 = vector.broadcast %cst_51 : f32 to vector<8x64xf32>
    %111 = arith.mulf %110, %106 : vector<8x64xf32>
    %cst_52 = arith.constant 4.471500e-02 : f32
    %112 = vector.broadcast %cst_52 : f32 to vector<8x64xf32>
    %113 = arith.mulf %112, %106 : vector<8x64xf32>
    %114 = arith.mulf %113, %106 : vector<8x64xf32>
    %115 = arith.mulf %114, %106 : vector<8x64xf32>
    %116 = arith.addf %106, %115 : vector<8x64xf32>
    %cst_53 = arith.constant 0.797884583 : f32
    %117 = vector.broadcast %cst_53 : f32 to vector<8x64xf32>
    %118 = arith.mulf %117, %116 : vector<8x64xf32>
    %119 = math.tanh %118 : vector<8x64xf32>
    %cst_54 = arith.constant 1.000000e+00 : f32
    %120 = vector.broadcast %cst_54 : f32 to vector<8x64xf32>
    %121 = arith.addf %120, %119 : vector<8x64xf32>
    %122 = arith.mulf %111, %121 : vector<8x64xf32>
    %123 = arith.mulf %122, %109 : vector<8x64xf32>
    %124 = arith.truncf %123 : vector<8x64xf32> to vector<8x64xbf16>
    %c0_55 = arith.constant 0 : index
    %c0_56 = arith.constant 0 : index
    %125 = vector.load %arg8[%c0_55, %c0_56] : memref<64x32xbf16, #tpu.memory_space<vmem>>, vector<64x32xbf16>
    %cst_57 = arith.constant dense<0.000000e+00> : vector<8x32xf32>
    %126 = tpu.matmul %124, %125, %cst_57 {dimension_numbers = #tpu.dot_dimension_numbers<[1], [0], [0], [1], [0, 0, 1, 1], [], []>} : vector<8x64xbf16>, vector<64x32xbf16>, vector<8x32xf32> -> vector<8x32xf32>
    %127 = arith.addf %90, %126 : vector<8x32xf32>
    %c0_58 = arith.constant 0 : index
    %c0_59 = arith.constant 0 : index
    %c0_60 = arith.constant 0 : index
    %128 = vector.load %arg9[%c0_58, %c0_59, %c0_60] : memref<1x8x32xf32, #tpu.memory_space<vmem>>, vector<1x8x32xf32>
    %129 = vector.shape_cast %128 : vector<1x8x32xf32> to vector<8x32xf32>
    %130 = vector.shape_cast %127 : vector<8x32xf32> to vector<1x8x32xf32>
    tpu.vector_store %arg9[%c0_58, %c0_59, %c0_60], %130 {strides = array<i32>} : memref<1x8x32xf32, #tpu.memory_space<vmem>>, vector<1x8x32xf32>,
    return
  }
  func.func @transform_0(%arg0: i32) -> (i32, i32, i32) {
    %c0_i32 = arith.constant 0 : i32
    %c0_i32_0 = arith.constant 0 : i32
    %c0_i32_1 = arith.constant 0 : i32
    return %arg0, %c0_i32, %c0_i32_0 : i32, i32, i32
  }
  func.func @transform_1(%arg0: i32) -> (i32, i32, i32, i32) {
    %c0_i32 = arith.constant 0 : i32
    %c0_i32_0 = arith.constant 0 : i32
    %c0_i32_1 = arith.constant 0 : i32
    %c0_i32_2 = arith.constant 0 : i32
    return %arg0, %c0_i32, %c0_i32_0, %c0_i32_1 : i32, i32, i32, i32
  }
  func.func @transform_2(%arg0: i32) -> (i32, i32) {
    %c0_i32 = arith.constant 0 : i32
    %c0_i32_0 = arith.constant 0 : i32
    %c0_i32_1 = arith.constant 0 : i32
    return %c0_i32, %c0_i32_0 : i32, i32
  }
  func.func @transform_3(%arg0: i32) -> (i32, i32, i32) {
    %c0_i32 = arith.constant 0 : i32
    %c0_i32_0 = arith.constant 0 : i32
    %c0_i32_1 = arith.constant 0 : i32
    %c0_i32_2 = arith.constant 0 : i32
    return %c0_i32, %c0_i32_0, %c0_i32_1 : i32, i32, i32
  }
  func.func @transform_4(%arg0: i32) -> (i32, i32, i32) {
    %c0_i32 = arith.constant 0 : i32
    %c0_i32_0 = arith.constant 0 : i32
    %c0_i32_1 = arith.constant 0 : i32
    %c0_i32_2 = arith.constant 0 : i32
    return %c0_i32, %c0_i32_0, %c0_i32_1 : i32, i32, i32
  }
  func.func @transform_5(%arg0: i32) -> (i32, i32, i32) {
    %c0_i32 = arith.constant 0 : i32
    %c0_i32_0 = arith.constant 0 : i32
    %c0_i32_1 = arith.constant 0 : i32
    %c0_i32_2 = arith.constant 0 : i32
    return %c0_i32, %c0_i32_0, %c0_i32_1 : i32, i32, i32
  }
  func.func @transform_6(%arg0: i32) -> (i32, i32, i32) {
    %c0_i32 = arith.constant 0 : i32
    %c0_i32_0 = arith.constant 0 : i32
    %c0_i32_1 = arith.constant 0 : i32
    %c0_i32_2 = arith.constant 0 : i32
    return %c0_i32, %c0_i32_0, %c0_i32_1 : i32, i32, i32
  }
  func.func @transform_7(%arg0: i32) -> (i32, i32) {
    %c0_i32 = arith.constant 0 : i32
    %c0_i32_0 = arith.constant 0 : i32
    %c0_i32_1 = arith.constant 0 : i32
    return %c0_i32, %c0_i32_0 : i32, i32
  }
  func.func @transform_8(%arg0: i32) -> (i32, i32, i32) {
    %c0_i32 = arith.constant 0 : i32
    %c0_i32_0 = arith.constant 0 : i32
    %c0_i32_1 = arith.constant 0 : i32
    return %arg0, %c0_i32, %c0_i32_0 : i32, i32, i32
  }
}

</mosaic_0001>

<bundles_post_ra>
// kernel: tpu_custom_call.1
= control target key start
LH: loop header
LB: loop body
LE: loop exit
PB: predicated region body
PF: predicated region fallthrough
CT: control target
= control target key end

     0   :  { %13 = vsyncpa [#allocation3], 0  ;;  %s1776_s0 = inlined_call_operand.vmem [shape: f32[2,8,32], index: 0, kind: input, shape index: {}]   ;;  %s1777_s1 = inlined_call_operand.vmem [shape: f32[2,2,8,16], index: 1, kind: input, shape index: {}]   ;;  %s1778_s2 = inlined_call_operand.vmem [shape: f32[2,32], index: 2, kind: input, shape index: {}]   ;;  %s1779_s3 = inlined_call_operand.vmem [shape: bf16[4,32,16], index: 3, kind: input, shape index: {}]   ;;  %s1780_s4 = inlined_call_operand.vmem [shape: bf16[2,32,16], index: 4, kind: input, shape index: {}]   ;;  %s1781_s5 = inlined_call_operand.vmem [shape: bf16[4,16,32], index: 5, kind: input, shape index: {}]   ;;  %s1782_s6 = inlined_call_operand.vmem [shape: bf16[2,32,64], index: 6, kind: input, shape index: {}]   ;;  %s1783_s7 = inlined_call_operand.vmem [shape: bf16[64,32], index: 7, kind: input, shape index: {}]   ;;  %s1784_s8 = inlined_call_operand.hbm [shape: f32[2,8,32], index: 8, kind: output, shape index: {}]  }
   0x1   :  { %15 = vsyncpa [#allocation3 + $0x1], 0  ;;  %s1495_s27 = smov 0   ;;  %s1497_s28 = smov 0  }
   0x2   :  { %s1499_s29 = smov 0   ;;  %s1501_s30 = smov 0  }
   0x3 LB: > { %s1516_s9 = sadd.s32 4294967295, %s1443_s30   ;;  %s1150_s10 = sadd.s32 4294967294, %s1443_s30   ;;  %s1443_s30 = sphi %s1501_s30, %s1790_s30   ;;  %s1439_s29 = sphi %s1499_s29, %s1789_s29   ;;  %s1435_s28 = sphi %s1497_s28, %s1788_s28   ;;  %s1431_s27 = sphi %s1495_s27, %s1787_s27  }
   0x4   : > { %s1520_s11 = sadd.s32 1, %s1443_s30   ;;  %s206_s12 = sadd.s32 1, %s1439_s29 }
   0x5   : > { %s203_s13 = ssub.s32 %s1443_s30, %s1520_s11  ;;  %p216_p0 = scmp.ne.s32.totalorder %s1439_s29, %s1435_s28 }
   0x6   : > { %p204_p1 = scmp.eq.s32.totalorder %s203_s13, 0  ;;  %p217_p2 = scmp.eq.s32.totalorder %s1516_s9, 1 }
   0x7   : > { %p222_p3 = scmp.ne.s32.totalorder %s1435_s28, %s1431_s27  ;;  %p223_p4 = scmp.eq.s32.totalorder %s1150_s10, 1 }
   0x8   : > { %s1531_s14 = scalar_select %p204_p1, %s1439_s29, %s206_s12  }
   0x9   : > { %p1533_p5 = por %p217_p2, %p216_p0  ;;  %p1537_p6 = por %p223_p4, %p222_p3 }
   0xa   : > { %p1153_p7 = scmp.ge.s32.totalorder %s1443_s30, 1  ;;  %p274_p8 = scmp.lt.s32.totalorder %s1443_s30, 3 }
   0xc   : > { %p275_p9 = pnand %p1153_p7, %p274_p8 }
   0xd   : > { %p312_p10 = scmp.lt.s32.totalorder (!%p275_p9), %s1516_s9, 1  ;;  %s1446_s24 = smov (!%p275_p9), 16  }
   0xe   : > { %278 = sbr.rel (%p275_p9) target bundleno = 1779 (0x6f3), region = 52  ;;  %s1447_s13 = smov (!%p275_p9), 8  }
  0x13   : > { %s1545_s17 = scalar_select %p312_p10, %s1516_s9, 1  ;;  %vm325_vm0 = vcmask 261120   ;;  %v1445_v3 = vmov 32.0   ;;  %v1290_v7 = vld [vmem:[%s1779_s3 + $0x8] sm:$0xff]  ;;  %v1292_v8 = vld [vmem:[%s1779_s3 + $0x18] sm:$0xff]  ;;  %v1289_v12 = vld [vmem:[%s1779_s3] sm:$0xff]  ;;  %v533_v49 = vlaneseq }
  0x14   : > { %1357 = vrcp.f32 %v1445_v3  ;;  %v1294_v9 = vld [vmem:[%s1779_s3 + $0x28] sm:$0xff]  ;;  %v1296_v10 = vld [vmem:[%s1779_s3 + $0x38] sm:$0xff]  ;;  %389 = vmatpush.bf16.msra.mxu0 %v1290_v7  ;;  %414 = vmatpush.bf16.msra.mxu1 %v1292_v8  ;;  %v1291_v13 = vld [vmem:[%s1779_s3 + $0x10] sm:$0xff]  ;;  %vm538_vm6 = vcmask 1047680   ;;  %vm614_vm7 = vcmask 130048   ;;  %vm746_vm8 = vcmask 1043456  }
  0x15   : > { %s1155_s18 = sshll.u32 %s1545_s17, 3  ;;  %439 = vmatpush.bf16.msra.mxu2 %v1294_v9  ;;  %464 = vmatpush.bf16.msra.mxu3 %v1296_v10  ;;  %v1293_v14 = vld [vmem:[%s1779_s3 + $0x20] sm:$0xff]  ;;  %v1295_v15 = vld [vmem:[%s1779_s3 + $0x30] sm:$0xff]  ;;  %v1298_v18 = vld [vmem:[%s1780_s4 + $0x8] sm:$0xff]  ;;  %s1288_s25 = sshll.u32 %s1545_s17, 4  ;;  %v1635_v51 = vand.u32 127, %v533_v49 }
  0x16   : > { %s315_s21 = scalar_lea.vmem %s1776_s0, %s1155_s18  ;;  %v1300_v19 = vld [vmem:[%s1780_s4 + $0x18] sm:$0xff]  ;;  %v1297_v21 = vld [vmem:[%s1780_s4] sm:$0xff]  ;;  %v1299_v22 = vld [vmem:[%s1780_s4 + $0x10] sm:$0xff]  ;;  %s1631_s12 = scalar_lea.vmem %s1777_s1, %s1288_s25  ;;  %vm694_vm10 = vcmask 64512   ;;  %vm1044_vm14 = vcmask 523264  }
  0x17   : > { %v1551_v0 = vld [vmem:[%s315_s21] sm:$0xff]  ;;  %v1216_v50 = vld [vmem:[%s1631_s12 + $0x8] sm:$0xff]  ;;  %vm535_vm5 = vcmp.lt.s32.totalorder %v1635_v51, 8  ;;  %s1448_s17 = smov 120  }
  0x18   : > { %v324_v1 = vmul.f32 %v1551_v0, %v1551_v0  ;;  %390 = vmatpush.bf16.msra.mxu0 %v1289_v12  ;;  %415 = vmatpush.bf16.msra.mxu1 %v1291_v13  ;;  %v1598_v29 = vld [vmem:[%s1778_s2] sm:$0x3]  ;;  %v536_v52 = vsub.f32 0.0, %v1216_v50 }
  0x19   : > { %440 = vmatpush.bf16.msra.mxu2 %v1293_v14  ;;  %465 = vmatpush.bf16.msra.mxu3 %v1295_v15  ;;  %v349_v32 = vperm.slane %v1598_v29, 0 }
  0x1a   : > { %v326_v2 = vsel %vm325_vm0, %v324_v1, 0.0  ;;  %v1358_v4 = vpop.eup %1357  ;;  %v537_v53 = vsel %vm535_vm5, %v536_v52, %v1216_v50 }
  0x1b   : > { %327 = vadd.xlane.f32.xlu0 %v326_v2  ;;  %v330_v5 = vmul.f32 32.0, %v1358_v4  ;;  %vm334_vm1 = vweird.f32 %v1358_v4 }
  0x1c   : > { %493 = vmatpush.bf16.msrb.mxu0 %v1298_v18  ;;  %523 = vmatpush.bf16.msrb.mxu1 %v1300_v19  ;;  %v530_v18 = vld [vmem:[%s1631_s12] sm:$0xff] }
  0x1d   : > { %v331_v6 = vsub.f32 1.0, %v330_v5 }
  0x1f   : > { %v332_v11 = vmul.f32 %v1358_v4, %v331_v6 }
  0x20   : > { %494 = vmatpush.bf16.msrb.mxu0 %v1297_v21  ;;  %524 = vmatpush.bf16.msrb.mxu1 %v1299_v22 }
  0x21   : > { %v333_v16 = vadd.f32 %v1358_v4, %v332_v11 }
  0x23   : > { %v1580_v17 = vsel %vm334_vm1, %v1358_v4, %v333_v16 }
  0x8e   : > { %v328_v20 = vpop.xlane.xlu0 %327 }
  0x8f   : > { %v336_v23 = vmul.f32 %v1580_v17, %v328_v20 }
  0x91   : > { %v337_v24 = vadd.f32 1e-06, %v336_v23 }
  0x93   : > { %1359 = vrsqrt.f32 %v337_v24  ;;  %vm344_vm3 = vweird.f32 %v337_v24 }
  0x99   : > { %v1360_v25 = vpop.eup %1359 }
  0x9a   : > { %v339_v26 = vmul.f32 %v1360_v25, %v337_v24  ;;  %vm345_vm2 = vweird.f32 %v1360_v25 }
  0x9b   : > { %vm346_vm4 = vmor %vm344_vm3, %vm345_vm2 }
  0x9c   : > { %v340_v27 = vmul.f32 %v1360_v25, %v339_v26 }
  0x9e   : > { %v341_v28 = vmul.f32 0.5, %v340_v27 }
  0xa0   : > { %v342_v30 = vsub.f32 1.5, %v341_v28 }
  0xa2   : > { %v343_v31 = vmul.f32 %v1360_v25, %v342_v30 }
  0xa4   : > { %v347_v33 = vsel %vm346_vm4, %v1360_v25, %v343_v31 }
  0xa5   : > { %v348_v34 = vmul.f32 %v347_v33, %v1551_v0 }
  0xa7   : > { %v350_v35 = vmul.f32 %v349_v32, %v348_v34 }
  0xa9   : > { %v351_v36 = vpack.c.bf16 %v350_v35, %v350_v35 }
  0xab   : > { %1166 = vmatmul.msk.bf16.vlgmr.msra.gmra.mxu0 %vm325_vm0, %v351_v36  ;;  %1175 = vmatmul.msk.bf16.vlgmr.msra.gmra.mxu1 %vm325_vm0, %v351_v36 }
  0xac   : > { %1184 = vmatmul.msk.bf16.vlgmr.msra.gmra.mxu2 %vm325_vm0, %v351_v36  ;;  %1193 = vmatmul.msk.bf16.vlgmr.msra.gmra.mxu3 %vm325_vm0, %v351_v36 }
  0xbb   : > { %1202 = vmatmul.msk.bf16.vlgmr.msrb.gmra.mxu0 %vm325_vm0, %v351_v36  ;;  %1215 = vmatmul.msk.bf16.vlgmr.msrb.gmra.mxu1 %vm325_vm0, %v351_v36 }
 0x128   : > { %v1608_v37 = vpop.f32.mrf.mxu0  ;;  %v1610_v38 = vpop.f32.mrf.mxu1 }
 0x129   : > { %539 = vrot.lane.b32.xlu1 %v1608_v37, %s1446_s24  ;;  %v564_v25 = vmul.f32 %v530_v18, %v1610_v38  ;;  %v563_v35 = vmul.f32 %v530_v18, %v1608_v37 }
 0x12f   : > { %v1614_v39 = vpop.f32.mrf.mxu2  ;;  %v1616_v40 = vpop.f32.mrf.mxu3 }
 0x130   : > { %545 = vrot.lane.b32.xlu2 %v1614_v39, %s1446_s24  ;;  %v394_v41 = vpop.f32.mrf.mxu0  ;;  %v419_v42 = vpop.f32.mrf.mxu1  ;;  %v565_v30 = vmul.f32 %v530_v18, %v1614_v39 }
 0x131   : > { %542 = vrot.lane.b32.xlu1 %v1610_v38, %s1446_s24 }
 0x137   : > { %v444_v43 = vpop.f32.mrf.mxu2  ;;  %v469_v44 = vpop.f32.mrf.mxu3 }
 0x138   : > { %548 = vrot.lane.b32.xlu2 %v1616_v40, %s1446_s24  ;;  %v496_v45 = vpop.f32.mrf.mxu0  ;;  %v1624_v46 = vpop.f32.mrf.mxu1 }
 0x139   : > { %596 = vrot.lane.b32.xlu0 %v496_v45, %s1446_s24  ;;  %v595_v19 = vmul.f32 %v530_v18, %v496_v45  ;;  %v609_v22 = vpack.c.bf16 %v1624_v46, %v1624_v46 }
 0x13b   : > { %v748_v27 = vsel %vm746_vm8, %v609_v22, 0 }
 0x140   : > { %v498_v47 = vpop.f32.mrf.mxu0  ;;  %v528_v48 = vpop.f32.mrf.mxu1  ;;  %568 = vrot.lane.b32.xlu2 %v537_v53, %s1447_s13  ;;  %s309_s13 = sand.u32 1, %s1435_s28  }
 0x141   : > { %v1449_v47 = vmov -1e+09   ;;  %s1154_s18 = sshll.u32 %s309_s13, 3  ;;  %s1064_s25 = scalar_lea.sflag [#allocation3], %s309_s13 }
 0x142   : > { %s311_s22 = scalar_lea.vmem [#allocation2], %s1154_s18 }
 0x143   : > { %s1076_s23 = sshll.u32 %s311_s22, 4  ;;  %s1077_s23 = int_to_ptr.vmem [resolvable:$true] %s1076_s23 }
 0x18a   : > { %v546_v54 = vpop.permute.xlu2 %545 }
 0x18b   : > { %v547_v55 = vsel %vm538_vm6, %v546_v54, %v1614_v39 }
 0x18c   : > { %555 = vrot.lane.b32.xlu0 %v547_v55, %s1446_s24 }
 0x192   : > { %v549_v62 = vpop.permute.xlu2 %548 }
 0x193   : > { %v550_v63 = vsel %vm538_vm6, %v549_v62, %v1616_v40 }
 0x19a   : > { %v569_v1 = vpop.permute.xlu2 %568 }
 0x19b   : > { %v540_v56 = vpop.permute.xlu1 %539 }
 0x19c   : > { %v541_v61 = vsel %vm538_vm6, %v540_v56, %v1608_v37 }
 0x1a3   : > { %v543_v57 = vpop.permute.xlu1 %542 }
 0x1a4   : > { %v544_v58 = vsel %vm538_vm6, %v543_v57, %v1610_v38 }
 0x1a5   : > { %553 = vrot.lane.b32.xlu2 %v544_v58, %s1446_s24 }
 0x1ab   : > { %v597_v59 = vpop.permute.xlu0 %596 }
 0x1ac   : > { %v598_v60 = vsel %vm538_vm6, %v597_v59, %v496_v45 }
 0x1ad   : > { %599 = vrot.lane.b32.xlu1 %v598_v60, %s1446_s24 }
 0x1b5   : > { %551 = vrot.lane.b32.xlu1 %v541_v61, %s1446_s24 }
 0x1bd   : > { %557 = vrot.lane.b32.xlu1 %v550_v63, %s1446_s24 }
 0x1fe   : > { %v556_v8 = vpop.permute.xlu0 %555 }
 0x1ff   : > { %v554_v2 = vpop.permute.xlu2 %553  ;;  %v561_v9 = vsel %vm538_vm6, %v556_v8, %v1614_v39  ;;  %v566_v39 = vmul.f32 %v530_v18, %v1616_v40 }
 0x200   : > { %v560_v3 = vsel %vm538_vm6, %v554_v2, %v1610_v38  ;;  %v573_v12 = vmul.f32 %v569_v1, %v561_v9 }
 0x201   : > { %v572_v4 = vmul.f32 %v569_v1, %v560_v3 }
 0x203   : > { %581 = vrot.lane.b32.xlu1 %v572_v4, %s1448_s17 }
 0x21f   : > { %v600_v5 = vpop.permute.xlu1 %599 }
 0x220   : > { %v601_v6 = vsel %vm538_vm6, %v600_v5, %v496_v45  ;;  %v687_v45 = vshrl.u32 %v533_v49, 7 }
 0x221   : > { %v602_v7 = vmul.f32 %v601_v6, %v569_v1 }
 0x222   : > { %vm688_vm9 = vcmp.le.s32.totalorder %v1635_v51, %v687_v45  ;;  %v1301_v45 = vld [vmem:[%s1781_s5] sm:$0xff] }
 0x223   : > { %604 = vrot.lane.b32.xlu2 %v602_v7, %s1448_s17  ;;  %v689_v48 = vsel %vm688_vm9, 0.0, %v1449_v47 }
 0x227   : > { %v552_v10 = vpop.permute.xlu1 %551 }
 0x228   : > { %v559_v11 = vsel %vm538_vm6, %v552_v10, %v1608_v37 }
 0x229   : > { %v571_v13 = vmul.f32 %v569_v1, %v559_v11 }
 0x22b   : > { %579 = vrot.lane.b32.xlu0 %v571_v13, %s1448_s17  ;;  %583 = vrot.lane.b32.xlu2 %v573_v12, %s1448_s17 }
 0x22f   : > { %v558_v14 = vpop.permute.xlu1 %557 }
 0x230   : > { %v562_v15 = vsel %vm538_vm6, %v558_v14, %v1616_v40 }
 0x231   : > { %v574_v16 = vmul.f32 %v569_v1, %v562_v15 }
 0x233   : > { %585 = vrot.lane.b32.xlu0 %v574_v16, %s1448_s17  ;;  %s1285_s17 = sshll.u32 %s1516_s9, 3 }
 0x234   : > { %s1074_s21 = scalar_lea.hbm %s1784_s8, %s1285_s17  ;;  %s1401_s17 = scalar_lea.hbm %s1784_s8, 16 }
 0x235   : > { %s1078_s24 = sshll.u32 %s1074_s21, 4  ;;  %s1079_s24 = int_to_ptr.hbm [resolvable:$true] %s1078_s24 }
 0x236   : > { %s1395_s26 = sshra.s32 %s1079_s24, 4  ;;  %s1396_s26 = int_to_ptr.hbm [resolvable:$true] %s1395_s26 }
 0x237   : > { %s1397_s9 = scalar_lea.hbm %s1396_s26, 8  ;;  %p1402_p0 = scmp.lt.s32.totalorder %s1396_s26, %s1784_s8 }
 0x238   : > { %p1398_p11 = scmp.ne.s32.totalorder %s1396_s26, %s1397_s9  ;;  %p1403_p1 = scmp.lt.s32.totalorder %s1401_s17, %s1397_s9 }
 0x23a   : > { %p1399_p12 = pnand %p1398_p11, %p1533_p5  ;;  %p1404_p2 = por %p1403_p1, %p1402_p0 }
 0x23c   : > { %p1400_p13 = pneg %p1399_p12 }
 0x23e   : > { %p1405_p3 = pnand %p1404_p2, %p1400_p13 }
 0x275   : > { %v582_v24 = vpop.permute.xlu1 %581 }
 0x276   : > { %v592_v28 = vadd.f32 %v582_v24, %v564_v25 }
 0x278   : > { %v611_v33 = vpack.c.bf16 %v592_v28, %v592_v28 }
 0x27d   : > { %v605_v20 = vpop.permute.xlu2 %604 }
 0x27e   : > { %v607_v21 = vadd.f32 %v605_v20, %v595_v19 }
 0x280   : > { %v608_v23 = vpack.c.bf16 %v607_v21, %v607_v21 }
 0x282   : > { %v619_v26 = vsel %vm614_vm7, %v608_v23, 0 }
 0x283   : > { %628 = vmatpush.bf16.xpose.msrb.mxu2 %v619_v26  ;;  %644 = vmatpush.bf16.xpose.msrb.mxu3 %v619_v26 }
 0x284   : > { %660 = vmatpush.bf16.xpose.msra.mxu0 %v619_v26  ;;  %676 = vmatpush.bf16.xpose.msra.mxu1 %v619_v26 }
 0x285   : > { %v584_v31 = vpop.permute.xlu2 %583 }
 0x286   : > { %v593_v32 = vadd.f32 %v584_v31, %v565_v30 }
 0x288   : > { %v612_v34 = vpack.c.bf16 %v593_v32, %v593_v32 }
 0x28a   : > { %1218 = vmatmul.msk.bf16.vlgmr.msrb.gmra.mxu3 %vm614_vm7, %v611_v33 }
 0x28b   : > { %757 = vmatpush.bf16.msra.mxu2 %v748_v27  ;;  %773 = vmatpush.bf16.msra.mxu3 %v748_v27 }
 0x28c   : > { %789 = vmatpush.bf16.msrb.mxu0 %v748_v27  ;;  %805 = vmatpush.bf16.msrb.mxu1 %v748_v27 }
 0x28d   : > { %1219 = vmatmul.msk.bf16.vlgmr.msra.gmra.mxu0 %vm614_vm7, %v612_v34 }
 0x29d   : > { %v580_v36 = vpop.permute.xlu0 %579 }
 0x29e   : > { %v591_v38 = vadd.f32 %v580_v36, %v563_v35 }
 0x2a0   : > { %v610_v41 = vpack.c.bf16 %v591_v38, %v591_v38 }
 0x2a2   : > { %1217 = vmatmul.msk.bf16.vlgmr.msrb.gmra.mxu2 %vm614_vm7, %v610_v41 }
 0x2a3   : > { %839 = vmatpush.bf16.msrb.mxu2 %v1301_v45 }
 0x2a5   : > { %v586_v42 = vpop.permute.xlu0 %585 }
 0x2a6   : > { %v594_v43 = vadd.f32 %v586_v42, %v566_v39 }
 0x2a8   : > { %v613_v44 = vpack.c.bf16 %v594_v43, %v594_v43  ;;  %v1303_v43 = vld [vmem:[%s1781_s5 + $0x10] sm:$0xff] }
 0x2a9   : > { %883 = vmatpush.bf16.msra.mxu0 %v1303_v43 }
 0x2aa   : > { %1220 = vmatmul.msk.bf16.vlgmr.msra.gmra.mxu1 %vm614_vm7, %v613_v44  ;;  %v1302_v44 = vld [vmem:[%s1781_s5 + $0x8] sm:$0xff] }
 0x2ab   : > { %861 = vmatpush.bf16.msrb.mxu3 %v1302_v44 }
 0x30a   : > { %v662_v46 = vpop.f32.mrf.mxu0 }
 0x30b   : > { %v684_v37 = vmul.f32 0.25, %v662_v46  ;;  %v1304_v46 = vld [vmem:[%s1781_s5 + $0x18] sm:$0xff] }
 0x30c   : > { %905 = vmatpush.bf16.msra.mxu1 %v1304_v46 }
 0x30d   : > { %v692_v50 = vadd.f32 %v689_v48, %v684_v37  ;;  %v646_v52 = vpop.f32.mrf.mxu3 }
 0x30e   : > { %v683_v54 = vmul.f32 0.25, %v646_v52 }
 0x30f   : > { %v701_v53 = vsel %vm694_vm10, %v692_v50, -inf }
 0x310   : > { %702 = vmax.xlane.f32.xlu0 %v701_v53  ;;  %v691_v55 = vadd.f32 %v689_v48, %v683_v54 }
 0x312   : > { %v664_v40 = vpop.f32.mrf.mxu0  ;;  %v698_v56 = vsel %vm694_vm10, %v691_v55, -inf }
 0x313   : > { %699 = vmax.xlane.f32.xlu2 %v698_v56 }
 0x315   : > { %v648_v57 = vpop.f32.mrf.mxu3 }
 0x325   : > { %v630_v49 = vpop.f32.mrf.mxu2 }
 0x326   : > { %v682_v58 = vmul.f32 0.25, %v630_v49 }
 0x327   : > { %v678_v51 = vpop.f32.mrf.mxu1 }
 0x328   : > { %v685_v59 = vmul.f32 0.25, %v678_v51  ;;  %v690_v60 = vadd.f32 %v689_v48, %v682_v58 }
 0x32a   : > { %v695_v61 = vsel %vm694_vm10, %v690_v60, -inf  ;;  %v693_v62 = vadd.f32 %v689_v48, %v685_v59 }
 0x32b   : > { %696 = vmax.xlane.f32.xlu1 %v695_v61 }
 0x32c   : > { %v704_v63 = vsel %vm694_vm10, %v693_v62, -inf }
 0x32d   : > { %705 = vmax.xlane.f32.xlu2 %v704_v63  ;;  %v632_v1 = vpop.f32.mrf.mxu2 }
 0x32f   : > { %v680_v2 = vpop.f32.mrf.mxu1 }
 0x383   : > { %v703_v3 = vpop.xlane.xlu0 %702 }
 0x384   : > { %v709_v4 = vsub.f32 %v692_v50, %v703_v3 }
 0x386   : > { %v715_v5 = vmul.f32 1.442695, %v709_v4  ;;  %v700_v6 = vpop.xlane.xlu2 %699 }
 0x387   : > { %v708_v7 = vsub.f32 %v691_v55, %v700_v6 }
 0x388   : > { %1361 = vpow2.f32 %v715_v5 }
 0x389   : > { %v713_v8 = vmul.f32 1.442695, %v708_v7 }
 0x38b   : > { %1363 = vpow2.f32 %v713_v8 }
 0x38e   : > { %v1362_v9 = vpop.eup %1361 }
 0x38f   : > { %v725_v10 = vsel %vm694_vm10, %v1362_v9, 0.0 }
 0x390   : > { %726 = vadd.xlane.f32.xlu2 %v725_v10 }
 0x391   : > { %v1364_v11 = vpop.eup %1363 }
 0x392   : > { %v722_v12 = vsel %vm694_vm10, %v1364_v11, 0.0 }
 0x393   : > { %723 = vadd.xlane.f32.xlu0 %v722_v12  ;;  %v1306_v12 = vld [vmem:[%s1782_s6 + $0x8] sm:$0xff] }
 0x39e   : > { %v697_v13 = vpop.xlane.xlu1 %696 }
 0x39f   : > { %v707_v14 = vsub.f32 %v690_v60, %v697_v13  ;;  %v1308_v13 = vld [vmem:[%s1782_s6 + $0x18] sm:$0xff] }
 0x3a0   : > { %v706_v15 = vpop.xlane.xlu2 %705 }
 0x3a1   : > { %v711_v16 = vmul.f32 1.442695, %v707_v14  ;;  %v710_v18 = vsub.f32 %v693_v62, %v706_v15  ;;  %v1307_v14 = vld [vmem:[%s1782_s6 + $0x10] sm:$0xff] }
 0x3a3   : > { %1365 = vpow2.f32 %v711_v16  ;;  %v717_v19 = vmul.f32 1.442695, %v710_v18 }
 0x3a5   : > { %1367 = vpow2.f32 %v717_v19 }
 0x3a9   : > { %v1366_v20 = vpop.eup %1365 }
 0x3aa   : > { %v719_v21 = vsel %vm694_vm10, %v1366_v20, 0.0 }
 0x3ab   : > { %720 = vadd.xlane.f32.xlu1 %v719_v21  ;;  %v1368_v22 = vpop.eup %1367 }
 0x3ac   : > { %v728_v23 = vsel %vm694_vm10, %v1368_v22, 0.0 }
 0x3b3   : > { %729 = vadd.xlane.f32.xlu1 %v728_v23 }
 0x403   : > { %v727_v24 = vpop.xlane.xlu2 %726 }
 0x404   : > { %1369 = vrcp.f32 %v727_v24 }
 0x406   : > { %v724_v25 = vpop.xlane.xlu0 %723 }
 0x407   : > { %1371 = vrcp.f32 %v724_v25  ;;  %v936_v25 = vperm.slane %v1598_v29, 1  ;;  %v1310_v29 = vld [vmem:[%s1783_s7 + $0x8] sm:$0xff] }
 0x40a   : > { %v1370_v26 = vpop.eup %1369 }
 0x40b   : > { %v737_v27 = vmul.f32 %v1370_v26, %v1362_v9 }
 0x40d   : > { %v741_v28 = vpack.c.bf16 %v737_v27, %v737_v27  ;;  %v1372_v30 = vpop.eup %1371 }
 0x40e   : > { %v736_v31 = vmul.f32 %v1372_v30, %v1364_v11 }
 0x40f   : > { %1223 = vmatmul.msk.bf16.vlgmr.msrb.gmra.mxu0 %vm694_vm10, %v741_v28 }
 0x410   : > { %v740_v32 = vpack.c.bf16 %v736_v31, %v736_v31  ;;  %v1311_v31 = vld [vmem:[%s1783_s7 + $0x10] sm:$0xff] }
 0x412   : > { %1222 = vmatmul.msk.bf16.vlgmr.msra.gmra.mxu3 %vm694_vm10, %v740_v32  ;;  %v1309_v32 = vld [vmem:[%s1783_s7] sm:$0xff] }
 0x413   : > { %994 = vmatpush.bf16.msra.mxu3 %v1308_v13 }
 0x417   : > { %995 = vmatpush.bf16.msra.mxu3 %v1307_v14 }
 0x41e   : > { %v721_v33 = vpop.xlane.xlu1 %720 }
 0x41f   : > { %1373 = vrcp.f32 %v721_v33 }
 0x425   : > { %v1374_v34 = vpop.eup %1373 }
 0x426   : > { %v735_v35 = vmul.f32 %v1374_v34, %v1366_v20  ;;  %v730_v36 = vpop.xlane.xlu1 %729 }
 0x427   : > { %1375 = vrcp.f32 %v730_v36 }
 0x428   : > { %v739_v38 = vpack.c.bf16 %v735_v35, %v735_v35 }
 0x42a   : > { %1221 = vmatmul.msk.bf16.vlgmr.msra.gmra.mxu2 %vm694_vm10, %v739_v38 }
 0x42b   : > { %964 = vmatpush.bf16.msra.mxu2 %v1306_v12 }
 0x42d   : > { %v1376_v41 = vpop.eup %1375 }
 0x42e   : > { %v738_v39 = vmul.f32 %v1376_v41, %v1368_v22 }
 0x430   : > { %v742_v42 = vpack.c.bf16 %v738_v39, %v738_v39 }
 0x432   : > { %1224 = vmatmul.msk.bf16.vlgmr.msrb.gmra.mxu1 %vm694_vm10, %v742_v42 }
 0x48c   : > { %v791_v47 = vpop.f32.mrf.mxu0 }
 0x48d   : > { %v813_v48 = vpack.c.bf16 %v791_v47, %v791_v47 }
 0x48f   : > { %1239 = vmatmul.msk.bf16.vlgmr.msra.gmra.mxu0 %vm614_vm7, %v813_v48 }
 0x494   : > { %v793_v37 = vpop.f32.mrf.mxu0 }
 0x495   : > { %v775_v50 = vpop.f32.mrf.mxu3 }
 0x496   : > { %v812_v52 = vpack.c.bf16 %v775_v50, %v775_v50 }
 0x498   : > { %1234 = vmatmul.msk.bf16.vlgmr.msrb.gmra.mxu3 %vm614_vm7, %v812_v52 }
 0x49d   : > { %v777_v53 = vpop.f32.mrf.mxu3 }
 0x4ad   : > { %v759_v54 = vpop.f32.mrf.mxu2 }
 0x4ae   : > { %v811_v40 = vpack.c.bf16 %v759_v54, %v759_v54 }
 0x4af   : > { %v807_v55 = vpop.f32.mrf.mxu1 }
 0x4b0   : > { %v814_v56 = vpack.c.bf16 %v807_v55, %v807_v55  ;;  %1229 = vmatmul.msk.bf16.vlgmr.msrb.gmra.mxu2 %vm614_vm7, %v811_v40 }
 0x4b2   : > { %1244 = vmatmul.msk.bf16.vlgmr.msra.gmra.mxu1 %vm614_vm7, %v814_v56 }
 0x4b5   : > { %v761_v57 = vpop.f32.mrf.mxu2 }
 0x4b7   : > { %v809_v49 = vpop.f32.mrf.mxu1 }
 0x50c   : > { %v885_v58 = vpop.f32.mrf.mxu0 }
 0x50d   : > { %v914_v3 = vsel %vm325_vm0, %v885_v58, 0.0 }
 0x514   : > { %v887_v51 = vpop.f32.mrf.mxu0 }
 0x51b   : > { %v863_v59 = vpop.f32.mrf.mxu3 }
 0x51c   : > { %v912_v63 = vsel %vm325_vm0, %v863_v59, 0.0 }
 0x523   : > { %v865_v60 = vpop.f32.mrf.mxu3 }
 0x52f   : > { %v907_v61 = vpop.f32.mrf.mxu1 }
 0x530   : > { %v916_v6 = vsel %vm325_vm0, %v907_v61, 0.0 }
 0x533   : > { %v841_v62 = vpop.f32.mrf.mxu2 }
 0x534   : > { %v911_v1 = vsel %vm325_vm0, %v841_v62, 0.0 }
 0x535   : > { %v913_v2 = vadd.f32 %v912_v63, %v911_v1 }
 0x537   : > { %v915_v4 = vadd.f32 %v914_v3, %v913_v2  ;;  %v909_v5 = vpop.f32.mrf.mxu1 }
 0x539   : > { %v917_v7 = vadd.f32 %v916_v6, %v915_v4 }
 0x53b   : > { %v843_v8 = vpop.f32.mrf.mxu2  ;;  %v1708_v9 = vadd.f32 %v917_v7, %v1551_v0  ;;  %v1305_v0 = vld [vmem:[%s1782_s6] sm:$0xff] }
 0x53c   : > { %965 = vmatpush.bf16.msra.mxu2 %v1305_v0 }
 0x53d   : > { %v919_v10 = vmul.f32 %v1708_v9, %v1708_v9 }
 0x53f   : > { %v920_v11 = vsel %vm325_vm0, %v919_v10, 0.0 }
 0x540   : > { %921 = vadd.xlane.f32.xlu0 %v920_v11 }
 0x5b3   : > { %v922_v15 = vpop.xlane.xlu0 %921 }
 0x5b4   : > { %v923_v16 = vmul.f32 %v922_v15, %v1580_v17  ;;  %v1312_v17 = vld [vmem:[%s1783_s7 + $0x18] sm:$0xff] }
 0x5b5   : > { %1052 = vmatpush.bf16.msrb.mxu0 %v1312_v17 }
 0x5b6   : > { %v924_v18 = vadd.f32 1e-06, %v923_v16 }
 0x5b8   : > { %1377 = vrsqrt.f32 %v924_v18  ;;  %vm931_vm12 = vweird.f32 %v924_v18 }
 0x5b9   : > { %1053 = vmatpush.bf16.msrb.mxu0 %v1311_v31 }
 0x5bd   : > { %1054 = vmatpush.bf16.msrb.mxu0 %v1310_v29 }
 0x5be   : > { %v1378_v19 = vpop.eup %1377 }
 0x5bf   : > { %v926_v20 = vmul.f32 %v1378_v19, %v924_v18  ;;  %vm932_vm11 = vweird.f32 %v1378_v19 }
 0x5c0   : > { %vm933_vm13 = vmor %vm931_vm12, %vm932_vm11 }
 0x5c1   : > { %v927_v21 = vmul.f32 %v1378_v19, %v926_v20  ;;  %1055 = vmatpush.bf16.msrb.mxu0 %v1309_v32 }
 0x5c3   : > { %v928_v22 = vmul.f32 0.5, %v927_v21 }
 0x5c5   : > { %v929_v23 = vsub.f32 1.5, %v928_v22 }
 0x5c7   : > { %v930_v24 = vmul.f32 %v1378_v19, %v929_v23 }
 0x5c9   : > { %v934_v26 = vsel %vm933_vm13, %v1378_v19, %v930_v24 }
 0x5ca   : > { %v935_v27 = vmul.f32 %v934_v26, %v1708_v9 }
 0x5cc   : > { %v937_v28 = vmul.f32 %v936_v25, %v935_v27 }
 0x5ce   : > { %v938_v30 = vpack.c.bf16 %v937_v28, %v937_v28 }
 0x5d0   : > { %1253 = vmatmul.msk.bf16.vlgmr.msra.gmra.mxu2 %vm325_vm0, %v938_v30  ;;  %1266 = vmatmul.msk.bf16.vlgmr.msra.gmra.mxu3 %vm325_vm0, %v938_v30 }
 0x653   : > { %v967_v33 = vpop.f32.mrf.mxu2  ;;  %v997_v34 = vpop.f32.mrf.mxu3 }
 0x654   : > { %v1002_v35 = vmul.f32 0.044715, %v967_v33  ;;  %v1001_v45 = vmul.f32 0.5, %v967_v33 }
 0x656   : > { %v1003_v36 = vmul.f32 %v1002_v35, %v967_v33 }
 0x658   : > { %v1004_v38 = vmul.f32 %v1003_v36, %v967_v33 }
 0x65a   : > { %v1005_v41 = vadd.f32 %v1004_v38, %v967_v33 }
 0x65b   : > { %v969_v39 = vpop.f32.mrf.mxu2  ;;  %v999_v42 = vpop.f32.mrf.mxu3 }
 0x65c   : > { %v1006_v43 = vmul.f32 0.7978846, %v1005_v41 }
 0x65e   : > { %1379 = vtanh.f32 %v1006_v43 }
 0x664   : > { %v1380_v44 = vpop.eup %1379 }
 0x665   : > { %v1008_v46 = vadd.f32 1.0, %v1380_v44 }
 0x667   : > { %v1009_v47 = vmul.f32 %v1008_v46, %v1001_v45 }
 0x669   : > { %v1010_v48 = vmul.f32 %v1009_v47, %v997_v34 }
 0x66b   : > { %v1011_v37 = vpack.c.bf16 %v1010_v48, %v1010_v48 }
 0x66d   : > { %1283 = vmatmul.msk.bf16.vlgmr.msrb.gmra.mxu0 %vm1044_vm14, %v1011_v37 }
 0x6ea   : > { %v1057_v50 = vpop.f32.mrf.mxu0 }
 0x6eb   : > { %v1061_v52 = vadd.f32 %v1057_v50, %v1708_v9 }
 0x6ed   : > { %1062 = vst.msk [vmem:[%s311_s22] sm:$0xff] %vm325_vm0, %v1061_v52 }
 0x6ee   : > { %1408 = shalt.err (!%p1405_p3)
}
 0x6ef   : > { %1313 = dma.vmem_to_hbm [thread:$0]  (%p1533_p5), %s1077_s23, 128, %s1079_s24, %s1064_s25  }
 0x6f2   : > { %v1059_v53 = vpop.f32.mrf.mxu0 }
 0x6f3 PF: > { %p1319_p4 = scmp.ge.s32.totalorder %s1443_s30, 2  ;;  %s1090_s13 = sand.u32 1, %s1431_s27  }
 0x6f4   : > { %s1091_s20 = scalar_lea.sflag [#allocation3], %s1090_s13 }
 0x6f5   : > { %p1316_p7 = pnand %p1319_p4, %p1537_p6 }
 0x6f7   : > { %p1317_p8 = pneg %p1316_p7 }
 0x6f9   : > { %1426 = dma.done.wait (%p1317_p8), %s1091_s20, 128  }
 0x6fa   : > { %1428 = vsyncadd (%p1317_p8), %s1091_s20, 4294967168  ;;  %p18_p9 = scmp.ge.s32.totalorder %s1520_s11, 4   ;;  %s1787_s27 = smov %s1435_s28 }
 0x6fb   : > { %s1788_s28 = smov %s1439_s29  ;;  %s1789_s29 = smov %s1531_s14 }
 0x6fc   : > { %s1790_s30 = smov %s1520_s11  ;;  %20 = sbr.rel (!%p18_p9) target bundleno = 3 (0x3), region = 93 }
 0x701   :  { %1097 = vsyncpa [#allocation3], 1 }
 0x702   :  { %1099 = vsyncpa [#allocation3 + $0x1], 1 }

</bundles_post_ra>
